<compile_context>
chip_gen: v7x
topology: tpu7x:2x2x1
jax: 0.10.0
libtpu: 0.0.40
codegen_flags: <defaults>
</compile_context>

<pallas_src>
import functools

import jax
import jax.numpy as jnp
from jax.experimental import pallas as pl
from jax.experimental.pallas import tpu as pltpu


def _ls_ce_kernel(logits_ref, target_ref, out_ref, *, eps, c, n_valid, tile_n):
    """One row-tile: log-softmax + fused weighted loss -> per-tile partial sum."""
    i = pl.program_id(0)

    x = logits_ref[...].astype(jnp.float32)                        # (tile_n, C)
    m = jnp.max(x, axis=-1, keepdims=True)                         # lane reduce
    shifted = x - m
    lse = jnp.log(jnp.sum(jnp.exp(shifted), axis=-1, keepdims=True))
    logp = shifted - lse                                           # (tile_n, C)

    # Fused smoothing + NLL weights: eps/C everywhere, +(1-eps) at target column.
    col_ids = jax.lax.broadcasted_iota(jnp.int32, (tile_n, c), 1)  # (tile_n, C)
    tgt = target_ref[...]                                          # (tile_n, 1) int32
    w = jnp.where(col_ids == tgt,
                  jnp.float32(eps / c + (1.0 - eps)),
                  jnp.float32(eps / c))
    row_loss = -jnp.sum(w * logp, axis=-1, keepdims=True)          # (tile_n, 1)

    # Mask rows that are padding (beyond the true batch size).
    row_ids = i * tile_n + jax.lax.broadcasted_iota(jnp.int32, (tile_n, 1), 0)
    row_loss = jnp.where(row_ids < n_valid, row_loss, jnp.float32(0.0))

    partial = jnp.sum(row_loss)                                    # scalar
    # Lane-dense, unmasked store of this tile's partial sum (own output block
    # per grid step -> no cross-iteration carry -> "parallel" grid axis).
    out_ref[...] = jnp.full((1, 8, 128), partial, dtype=jnp.float32)


def label_smoothing_cross_entropy(logits, target, eps=0.1, reduction="mean",
                                  tile_n=None, vmem_limit_bytes=None):
    """Matches PyTorch LabelSmoothingCrossEntropy.forward for reduction in {'mean','sum'}."""
    n, c = logits.shape
    itemsize = jnp.dtype(logits.dtype).itemsize

    if tile_n is None:
        # Aim for a ~4 MiB logits block (double-buffered ~8 MiB), >= 8 rows,
        # multiple of 8, and no bigger than the (rounded-up) batch.
        tile_n = max(8, (4 * 1024 * 1024) // max(c * itemsize, 1))
        tile_n = min(tile_n, 1024)
        n_up8 = ((n + 7) // 8) * 8
        tile_n = min(tile_n, n_up8)
        tile_n = max(8, (tile_n // 8) * 8)

    num_tiles = pl.cdiv(n, tile_n)
    n_pad = num_tiles * tile_n

    logits_p = logits
    target_i = target.astype(jnp.int32)
    if n_pad != n:
        logits_p = jnp.pad(logits, ((0, n_pad - n), (0, 0)))
        target_i = jnp.pad(target_i, (0, n_pad - n))
    target2d = target_i.reshape(n_pad, 1)

    if vmem_limit_bytes is None:
        block_bytes = tile_n * c * itemsize
        needed = 2 * block_bytes + 2 * (tile_n * 4) + 2 * (8 * 128 * 4) + (2 << 20)
        # Keep under v7x's 64 MiB physical VMEM; raise above small scoped defaults.
        vmem_limit_bytes = int(min(max(needed, 16 << 20), 48 << 20))

    kernel = functools.partial(_ls_ce_kernel, eps=float(eps), c=c,
                               n_valid=n, tile_n=tile_n)

    partials = pl.pallas_call(
        kernel,
        out_shape=jax.ShapeDtypeStruct((num_tiles, 8, 128), jnp.float32),
        grid_spec=pltpu.PrefetchScalarGridSpec(
            num_scalar_prefetch=0,
            grid=(num_tiles,),
            in_specs=[
                pl.BlockSpec((tile_n, c), lambda i: (i, 0)),   # logits row-tile
                pl.BlockSpec((tile_n, 1), lambda i: (i, 0)),   # target row-tile
            ],
            out_specs=pl.BlockSpec((1, 8, 128), lambda i: (i, 0, 0)),
        ),
        compiler_params=pltpu.CompilerParams(
            dimension_semantics=("parallel",),                 # no carry -> megacore OK
            vmem_limit_bytes=vmem_limit_bytes,
        ),
    )(logits_p, target2d)

    total = jnp.sum(partials[:, 0, 0])                         # tiny final reduce in f32
    if reduction == "mean":
        return total / jnp.float32(n)
    elif reduction == "sum":
        return total
    else:
        raise NotImplementedError("only reduction in {'mean','sum'} is supported")


def _reference(logits, target, eps=0.1, reduction="mean"):
    """Pure-JAX reference reproducing the PyTorch forward."""
    c = logits.shape[-1]
    logp = jax.nn.log_softmax(logits.astype(jnp.float32), axis=-1)
    nll_per_row = -jnp.take_along_axis(logp, target[:, None].astype(jnp.int32), axis=-1)[:, 0]
    if reduction == "sum":
        loss = -jnp.sum(logp)
        nll = jnp.sum(nll_per_row)
    else:  # mean
        loss = jnp.mean(-jnp.sum(logp, axis=-1))
        nll = jnp.mean(nll_per_row)
    return loss * eps / c + (1.0 - eps) * nll


if __name__ == "__main__":
    key = jax.random.PRNGKey(0)
    k1, k2, k3, k4 = jax.random.split(key, 4)

    # Test 1: small f32, single tile.
    N1, C1 = 16, 32
    logits1 = jax.random.normal(k1, (N1, C1), dtype=jnp.float32)
    target1 = jax.random.randint(k2, (N1,), 0, C1, dtype=jnp.int32)
    loss1 = jax.block_until_ready(label_smoothing_cross_entropy(logits1, target1, eps=0.1))
    ref1 = _reference(logits1, target1, eps=0.1)
    assert jnp.allclose(loss1, ref1, atol=2e-5, rtol=2e-5), (loss1, ref1)

    # Test 2: multi-tile grid with row padding (N not a multiple of tile_n), f32, sum reduction too.
    N2, C2 = 40, 128
    logits2 = jax.random.normal(k3, (N2, C2), dtype=jnp.float32)
    target2 = jax.random.randint(k4, (N2,), 0, C2, dtype=jnp.int32)
    loss2 = jax.block_until_ready(
        label_smoothing_cross_entropy(logits2, target2, eps=0.1, tile_n=16))
    ref2 = _reference(logits2, target2, eps=0.1)
    assert jnp.allclose(loss2, ref2, atol=2e-5, rtol=2e-5), (loss2, ref2)

    loss2s = jax.block_until_ready(
        label_smoothing_cross_entropy(logits2, target2, eps=0.1, reduction="sum", tile_n=16))
    ref2s = _reference(logits2, target2, eps=0.1, reduction="sum")
    assert jnp.allclose(loss2s, ref2s, atol=1e-3, rtol=2e-5), (loss2s, ref2s)

    # Test 3: bf16 logits streamed as-is (upcast happens in-kernel).
    logits3 = logits1.astype(jnp.bfloat16)
    loss3 = jax.block_until_ready(label_smoothing_cross_entropy(logits3, target1, eps=0.1))
    ref3 = _reference(logits3, target1, eps=0.1)
    assert jnp.allclose(loss3, ref3, atol=2e-5, rtol=2e-5), (loss3, ref3)

    print("KERNEL_OK")
</pallas_src>

<mosaic_0001>
module attributes {stable_mosaic.version = 11 : i64} {
  func.func @_ls_ce_kernel(%arg0: i32, %arg1: memref<16x32xf32, #tpu.memory_space<vmem>>, %arg2: memref<16x1xi32, #tpu.memory_space<vmem>>, %arg3: memref<1x8x128xf32, #tpu.memory_space<vmem>>) attributes {dimension_semantics = [#tpu.dimension_semantics<parallel>], iteration_bounds = array<i64: 1>, scalar_prefetch = 0 : i64, scratch_operands = 0 : i64, tpu.core_type = #tpu.core_type<tc>, window_params = [{transform_indices = @transform_0, window_bounds = array<i64: 16, 32>}, {transform_indices = @transform_1, window_bounds = array<i64: 16, 1>}, {transform_indices = @transform_2, window_bounds = array<i64: 1, 8, 128>}]} {
    %c0 = arith.constant 0 : index
    %c0_0 = arith.constant 0 : index
    %0 = vector.load %arg1[%c0, %c0_0] : memref<16x32xf32, #tpu.memory_space<vmem>>, vector<16x32xf32>
    %cst = arith.constant dense<0xFF800000> : vector<16xf32>
    %1 = vector.multi_reduction <maximumf>, %0, %cst [1] : vector<16x32xf32> to vector<16xf32>
    %2 = vector.shape_cast %1 : vector<16xf32> to vector<16x1xf32>
    %3 = vector.broadcast %2 : vector<16x1xf32> to vector<16x32xf32>
    %4 = arith.subf %0, %3 : vector<16x32xf32>
    %5 = math.exp %4 : vector<16x32xf32>
    %cst_1 = arith.constant dense<0.000000e+00> : vector<16xf32>
    %6 = vector.multi_reduction <add>, %5, %cst_1 [1] : vector<16x32xf32> to vector<16xf32>
    %7 = vector.shape_cast %6 : vector<16xf32> to vector<16x1xf32>
    %8 = math.log %7 : vector<16x1xf32>
    %9 = vector.broadcast %8 : vector<16x1xf32> to vector<16x32xf32>
    %10 = arith.subf %4, %9 : vector<16x32xf32>
    %11 = tpu.iota {dimensions = array<i32: 1>} : vector<16x32xi32>
    %c0_2 = arith.constant 0 : index
    %c0_3 = arith.constant 0 : index
    %12 = vector.load %arg2[%c0_2, %c0_3] : memref<16x1xi32, #tpu.memory_space<vmem>>, vector<16x1xi32>
    %13 = vector.broadcast %12 : vector<16x1xi32> to vector<16x32xi32>
    %14 = arith.cmpi eq, %11, %13 : vector<16x32xi32>
    %cst_4 = arith.constant 0.903124988 : f32
    %cst_5 = arith.constant 3.125000e-03 : f32
    %15 = vector.broadcast %cst_4 : f32 to vector<16x32xf32>
    %16 = vector.broadcast %cst_5 : f32 to vector<16x32xf32>
    %17 = arith.select %14, %15, %16 : vector<16x32xi1>, vector<16x32xf32>
    %18 = arith.mulf %17, %10 : vector<16x32xf32>
    %cst_6 = arith.constant dense<0.000000e+00> : vector<16xf32>
    %19 = vector.multi_reduction <add>, %18, %cst_6 [1] : vector<16x32xf32> to vector<16xf32>
    %20 = vector.shape_cast %19 : vector<16xf32> to vector<16x1xf32>
    %cst_7 = arith.constant 0.000000e+00 : f32
    %21 = vector.broadcast %cst_7 : f32 to vector<16x1xf32>
    %22 = arith.subf %21, %20 : vector<16x1xf32>
    %c16_i32 = arith.constant 16 : i32
    %23 = arith.muli %arg0, %c16_i32 : i32
    %24 = tpu.iota {dimensions = array<i32: 0>} : vector<16x1xi32>
    %25 = vector.broadcast %23 : i32 to vector<16x1xi32>
    %26 = arith.addi %25, %24 : vector<16x1xi32>
    %c16_i32_8 = arith.constant 16 : i32
    %27 = vector.broadcast %c16_i32_8 : i32 to vector<16x1xi32>
    %28 = arith.cmpi slt, %26, %27 : vector<16x1xi32>
    %cst_9 = arith.constant 0.000000e+00 : f32
    %29 = vector.broadcast %cst_9 : f32 to vector<16x1xf32>
    %30 = arith.select %28, %22, %29 : vector<16x1xi1>, vector<16x1xf32>
    %31 = vector.shape_cast %30 : vector<16x1xf32> to vector<1x16x1xf32>
    %cst_10 = arith.constant dense<0.000000e+00> : vector<1xf32>
    %32 = vector.multi_reduction <add>, %31, %cst_10 [1, 2] : vector<1x16x1xf32> to vector<1xf32>
    %33 = vector.shape_cast %32 : vector<1xf32> to vector<1x1x1xf32>
    %34 = vector.extract %33[0, 0, 0] : f32 from vector<1x1x1xf32>
    %35 = vector.broadcast %34 : f32 to vector<1x8x128xf32>
    %c0_11 = arith.constant 0 : index
    %c0_12 = arith.constant 0 : index
    %c0_13 = arith.constant 0 : index
    %36 = vector.load %arg3[%c0_11, %c0_12, %c0_13] : memref<1x8x128xf32, #tpu.memory_space<vmem>>, vector<1x8x128xf32>
    tpu.vector_store %arg3[%c0_11, %c0_12, %c0_13], %35 {strides = array<i32>} : memref<1x8x128xf32, #tpu.memory_space<vmem>>, vector<1x8x128xf32>,
    return
  }
  func.func @transform_0(%arg0: i32) -> (i32, i32) {
    %c0_i32 = arith.constant 0 : i32
    %c0_i32_0 = arith.constant 0 : i32
    return %arg0, %c0_i32 : i32, i32
  }
  func.func @transform_1(%arg0: i32) -> (i32, i32) {
    %c0_i32 = arith.constant 0 : i32
    %c0_i32_0 = arith.constant 0 : i32
    return %arg0, %c0_i32 : i32, i32
  }
  func.func @transform_2(%arg0: i32) -> (i32, i32, i32) {
    %c0_i32 = arith.constant 0 : i32
    %c0_i32_0 = arith.constant 0 : i32
    %c0_i32_1 = arith.constant 0 : i32
    return %arg0, %c0_i32, %c0_i32_0 : i32, i32, i32
  }
}

</mosaic_0001>

<bundles_post_ra>
// kernel: tpu_custom_call.1
= control target key start
LH: loop header
LB: loop body
LE: loop exit
PB: predicated region body
PF: predicated region fallthrough
CT: control target
= control target key end

     0   :  { %vm14_vm0 = vcmask 261120   ;;  %s190_s0 = inlined_call_operand.vmem [shape: f32[16,32], index: 0, kind: input, shape index: {}]   ;;  %s191_s1 = inlined_call_operand.vmem [shape: s32[16,1], index: 1, kind: input, shape index: {}]   ;;  %s192_s2 = inlined_call_operand.hbm [shape: f32[1,8,128], index: 2, kind: output, shape index: {}]  }
   0x1   :  { %v12_v0 = vld [vmem:[%s190_s0] sm:$0xff]  ;;  %v13_v1 = vld [vmem:[%s190_s0 + $0x8] sm:$0xff] }
   0x2   :  { %7 = vsyncpa [#allocation3], 0  ;;  %v15_v2 = vsel %vm14_vm0, %v12_v0, -inf  ;;  %v18_v3 = vsel %vm14_vm0, %v13_v1, -inf  ;;  %v41_v4 = vld [vmem:[%s191_s1] sm:$0xff]  ;;  %v142_v5 = vmov 0   ;;  %v39_v18 = vlaneseq }
   0x3   :  { %16 = vmax.xlane.f32.xlu0 %v15_v2  ;;  %109 = vset.pattern.permute.xlu1 %v142_v5  ;;  %v42_v16 = vld [vmem:[%s191_s1 + $0x8] sm:$0xff]  ;;  %v143_v25 = vmov 0.003125   ;;  %vm74_vm3 = vcmask 7168   ;;  %s144_s1 = smov [#allocation2]  }
   0x4   :  { %108 = vset.pattern.permute.xlu0 %v142_v5  ;;  %v40_v20 = vand.u32 127, %v39_v18  ;;  %s95_s16 = sshll.u32 %s144_s1, 4  ;;  %s96_s16 = int_to_ptr.vmem [resolvable:$true] %s95_s16 }
   0x5   :  { %s118_s18 = scalar_lea.vmem %s96_s16, 128  ;;  %p123_p1 = scmp.lt.s32.totalorder %s96_s16, %s96_s16 }
   0x6   :  { %p119_p0 = scmp.ne.s32.totalorder %s96_s16, %s118_s18  ;;  %p124_p2 = scmp.lt.s32.totalorder %s118_s18, %s118_s18 }
   0x7   :  { %19 = vmax.xlane.f32.xlu0 %v18_v3 }
   0x8   :  { %p125_p3 = por %p124_p2, %p123_p1 }
   0xa   :  { %p126_p4 = pnand %p125_p3, %p119_p0 }
  0x1d   :  { %44 = vperm.xlu0 %108, %v41_v4  }
  0x90   :  { %v17_v6 = vpop.xlane.xlu0 %16 }
  0x91   :  { %v21_v7 = vsub.f32 %v12_v0, %v17_v6 }
  0x93   :  { %v23_v8 = vmul.f32 1.442695, %v21_v7 }
  0x94   :  { %v20_v9 = vpop.xlane.xlu0 %19 }
  0x95   :  { %110 = vpow2.f32 %v23_v8  ;;  %v22_v10 = vsub.f32 %v13_v1, %v20_v9 }
  0x97   :  { %v25_v11 = vmul.f32 1.442695, %v22_v10 }
  0x99   :  { %112 = vpow2.f32 %v25_v11 }
  0x9c   :  { %v45_v21 = vpop.permute.xlu0 %44 }
  0x9d   :  { %vm49_vm1 = vcmp.eq.s32.totalorder %v40_v20, %v45_v21 }
  0x9e   :  { %v51_v26 = vsel %vm49_vm1, 0.903125, %v143_v25 }
  0x9f   :  { %v111_v12 = vpop.eup %110 }
  0xa0   :  { %v27_v13 = vsel %vm14_vm0, %v111_v12, 0.0 }
  0xa1   :  { %28 = vadd.xlane.f32.xlu1 %v27_v13 }
  0xa3   :  { %v113_v14 = vpop.eup %112 }
  0xa4   :  { %v30_v15 = vsel %vm14_vm0, %v113_v14, 0.0 }
  0xa5   :  { %31 = vadd.xlane.f32.xlu1 %v30_v15 }
  0xb6   :  { %47 = vperm.xlu1 %109, %v42_v16  }
 0x12e   :  { %v29_v17 = vpop.xlane.xlu1 %28 }
 0x12f   :  { %114 = vlog2.f32 %v29_v17 }
 0x132   :  { %v32_v19 = vpop.xlane.xlu1 %31 }
 0x133   :  { %116 = vlog2.f32 %v32_v19 }
 0x136   :  { %v48_v23 = vpop.permute.xlu1 %47 }
 0x137   :  { %vm50_vm2 = vcmp.eq.s32.totalorder %v40_v20, %v48_v23 }
 0x138   :  { %v52_v31 = vsel %vm50_vm2, 0.903125, %v143_v25 }
 0x139   :  { %v115_v22 = vpop.eup %114 }
 0x13a   :  { %v34_v24 = vmul.f32 0.6931472, %v115_v22 }
 0x13c   :  { %v37_v27 = vsub.f32 %v21_v7, %v34_v24 }
 0x13d   :  { %v117_v28 = vpop.eup %116 }
 0x13e   :  { %v36_v29 = vmul.f32 0.6931472, %v117_v28  ;;  %v53_v30 = vmul.f32 %v51_v26, %v37_v27 }
 0x140   :  { %v55_v32 = vsel %vm14_vm0, %v53_v30, 0.0  ;;  %v38_v33 = vsub.f32 %v22_v10, %v36_v29 }
 0x141   :  { %56 = vadd.xlane.f32.xlu1 %v55_v32 }
 0x142   :  { %v54_v34 = vmul.f32 %v52_v31, %v38_v33 }
 0x144   :  { %v58_v35 = vsel %vm14_vm0, %v54_v34, 0.0 }
 0x145   :  { %59 = vadd.xlane.f32.xlu0 %v58_v35 }
 0x1ce   :  { %v57_v36 = vpop.xlane.xlu1 %56 }
 0x1cf   :  { %v61_v37 = vsub.f32 0.0, %v57_v36 }
 0x1d1   :  { %v75_v41 = vsel %vm74_vm3, %v61_v37, 0.0 }
 0x1d2   :  { %v60_v38 = vpop.xlane.xlu0 %59 }
 0x1d3   :  { %v62_v39 = vsub.f32 0.0, %v60_v38 }
 0x1d5   :  { %v76_v40 = vsel %vm74_vm3, %v62_v39, 0.0 }
 0x1d6   :  { %v77_v42 = vadd.f32 %v76_v40, %v75_v41 }
 0x1d8   :  { %78 = vadd.xlane.f32.xlu1 %v77_v42 }
 0x265   :  { %v79_v43 = vpop.xlane.xlu1 %78 }
 0x266   :  { %v80_v44 = vrot.slane %v79_v43, 4 }
 0x268   :  { %v81_v45 = vadd.f32 %v80_v44, %v79_v43 }
 0x26a   :  { %v82_v46 = vrot.slane %v81_v45, 2 }
 0x26c   :  { %v83_v47 = vadd.f32 %v82_v46, %v81_v45 }
 0x26e   :  { %v84_v48 = vrot.slane %v83_v47, 1 }
 0x270   :  { %v85_v49 = vadd.f32 %v84_v48, %v83_v47 }
 0x272   :  { %103 = vpush %v85_v49 }
 0x2a3   :  { %s104_s17 = spop %103 }
 0x2a4   :  { %v87_v50 = vstv %s104_s17 }
 0x2a5   :  { %88 = vst [vmem:[#allocation2] sm:$0xff] %v87_v50 }
 0x2a6   :  { %129 = shalt.err (!%p126_p4)
}
 0x2a7   :  { %s130_s21 = scalar_lea.hbm %s192_s2, 128 }
 0x2a8   :  { %p131_p5 = scmp.ne.s32.totalorder %s192_s2, %s130_s21  ;;  %p134_p6 = scmp.lt.u32.totalorder %s130_s21, %s192_s2 }
 0x2aa   :  { %p136_p7 = pnand %p134_p6, %p131_p5 }
 0x2ac   :  { %139 = shalt.err (!%p136_p7)
}
 0x2ad   :  { %98 = dma.vmem_to_hbm [thread:$0]  %s96_s16, 128, %s192_s2, [#allocation3]  }
 0x2ae   :  { %140 = dma.done.wait [#allocation3], 128  }
 0x2af   :  { %141 = vsyncadd [#allocation3], 4294967168 }
 0x2b0   :  { %102 = vsyncpa [#allocation3], 1 }

</bundles_post_ra>
